<compile_context>
chip_gen: v7x
topology: tpu7x:2x2x1
jax: 0.10.0
libtpu: 0.0.40
codegen_flags: <defaults>
</compile_context>

<pallas_src>
import functools
import math

import jax
import jax.numpy as jnp
from jax.experimental import pallas as pl
from jax.experimental.pallas import tpu as pltpu


_TILE_BYTES = 8 * 1024 * 1024        # ~8 MiB per input block
_VMEM_LIMIT = 48 * 1024 * 1024       # 2 arrays x 2 buffers x 8 MiB = 32 MiB + headroom
                                     # (fits v7x's 64 MiB physical VMEM; v5e/v6e have 128 MiB)


# ----------------------------- Pallas kernels -------------------------------

def _ln_rows_kernel(x_ref, g_ref, b_ref, o_ref, *, eps):
    """LayerNorm over the last axis of a (TM, D) row tile (channels_last)."""
    x = x_ref[...].astype(jnp.float32)                       # (TM, D)
    mu = jnp.mean(x, axis=-1, keepdims=True)
    xc = x - mu
    var = jnp.mean(xc * xc, axis=-1, keepdims=True)          # two-pass, biased (torch)
    inv = jax.lax.rsqrt(var + eps)
    y = xc * inv * g_ref[...].astype(jnp.float32) + b_ref[...].astype(jnp.float32)
    o_ref[...] = y.astype(o_ref.dtype)


def _ln_rows_packed_kernel(x_ref, g_ref, b_ref, o_ref, *, eps, d, k):
    """channels_last with small D: k rows packed into one 128-lane row.

    x_ref is (TM, k*d) with k*d == 128 (lane-dense HBM loads/stores); each
    contiguous d-lane segment is an independent LayerNorm group.  Stats are
    computed exactly per group on lane-aligned static slices (all in VMEM).
    """
    x = x_ref[...].astype(jnp.float32)                        # (TM, k*d)
    gamma = g_ref[...].astype(jnp.float32)                    # (1, d)
    beta = b_ref[...].astype(jnp.float32)                     # (1, d)
    for g in range(k):                                        # unrolled at trace time
        sl = slice(g * d, (g + 1) * d)
        xg = x[:, sl]                                         # (TM, d)
        mu = jnp.mean(xg, axis=-1, keepdims=True)
        xc = xg - mu
        var = jnp.mean(xc * xc, axis=-1, keepdims=True)
        inv = jax.lax.rsqrt(var + eps)
        o_ref[:, sl] = (xc * inv * gamma + beta).astype(o_ref.dtype)


def _ln_chan_kernel(x_ref, g_ref, b_ref, o_ref, *, eps):
    """LayerNorm over the channel (sublane) axis of a (TB, C, TW) tile."""
    x = x_ref[...].astype(jnp.float32)                        # (TB, C, TW)
    mu = jnp.mean(x, axis=1, keepdims=True)                   # (TB, 1, TW)
    xc = x - mu
    var = jnp.mean(xc * xc, axis=1, keepdims=True)
    inv = jax.lax.rsqrt(var + eps)
    y = xc * inv * g_ref[...].astype(jnp.float32) + b_ref[...].astype(jnp.float32)
    o_ref[...] = y.astype(o_ref.dtype)


# ------------------------------- helpers ------------------------------------

def _round_up(x, m):
    return ((x + m - 1) // m) * m


def _pick_row_tile(m, row_elems, itemsize, override):
    """Row-tile size: multiple of 8 (or the full extent), capped by VMEM budget,
    and small enough that the grid has >= 2 blocks (v7x megacore)."""
    if m <= 8:
        return m
    if override is not None:
        tm = max(8, (int(override) // 8) * 8)
    else:
        budget_rows = (_TILE_BYTES // max(1, row_elems * itemsize)) // 8 * 8
        tm = min(max(8, budget_rows), 4096)
    half = _round_up((m + 1) // 2, 8)          # ensures at least 2 grid blocks
    return max(8, min(tm, half))


def _cost(numel, groups, io_bytes, param_bytes):
    return pl.CostEstimate(flops=10 * numel,
                           transcendentals=groups,
                           bytes_accessed=io_bytes + param_bytes)


# ------------------------------- wrappers ------------------------------------

def _layer_norm_channels_last(x, weight, bias, eps, block_rows):
    orig_shape = x.shape
    D = orig_shape[-1]
    M = math.prod(orig_shape[:-1]) if len(orig_shape) > 1 else 1
    itemsize = jnp.dtype(x.dtype).itemsize
    param_bytes = (weight.size + bias.size) * jnp.dtype(weight.dtype).itemsize
    cost = _cost(M * D, M, 2 * M * D * itemsize, param_bytes)
    cparams = pltpu.CompilerParams(dimension_semantics=("parallel",),
                                   vmem_limit_bytes=_VMEM_LIMIT)

    w2 = weight.reshape(1, D)
    b2 = bias.reshape(1, D)

    # Lane-dense packed path: k rows per 128-lane row (free row-major reshape).
    use_packed = (8 <= D < 128) and (128 % D == 0) and (M % (128 // D) == 0)
    if use_packed:
        k = 128 // D
        L = 128
        Mp = M // k
        xp = x.reshape(Mp, L)                                 # no data movement
        tm = _pick_row_tile(Mp, L, itemsize, block_rows)
        out = pl.pallas_call(
            functools.partial(_ln_rows_packed_kernel, eps=eps, d=D, k=k),
            out_shape=jax.ShapeDtypeStruct((Mp, L), x.dtype),
            grid=(pl.cdiv(Mp, tm),),
            in_specs=[pl.BlockSpec((tm, L), lambda i: (i, 0)),
                      pl.BlockSpec((1, D), lambda i: (0, 0)),
                      pl.BlockSpec((1, D), lambda i: (0, 0))],
            out_specs=pl.BlockSpec((tm, L), lambda i: (i, 0)),
            compiler_params=cparams,
            cost_estimate=cost,
        )(xp, w2, b2)
        return out.reshape(orig_shape)

    # Direct row path (lane-dense whenever D % 128 == 0).
    # TODO(synk): D neither a multiple of 128 nor a divisor of 128 (e.g. 96, 192)
    # still emits masked lane stores; a full repack would need an HBM transpose.
    x2 = x.reshape(M, D)
    tm = _pick_row_tile(M, D, itemsize, block_rows)
    out = pl.pallas_call(
        functools.partial(_ln_rows_kernel, eps=eps),
        out_shape=jax.ShapeDtypeStruct((M, D), x.dtype),
        grid=(pl.cdiv(M, tm),),
        in_specs=[pl.BlockSpec((tm, D), lambda i: (i, 0)),
                  pl.BlockSpec((1, D), lambda i: (0, 0)),
                  pl.BlockSpec((1, D), lambda i: (0, 0))],
        out_specs=pl.BlockSpec((tm, D), lambda i: (i, 0)),
        compiler_params=cparams,
        cost_estimate=cost,
    )(x2, w2, b2)
    return out.reshape(orig_shape)


def _layer_norm_channels_first(x, weight, bias, eps, block_lanes):
    B, C, H, W = x.shape
    HW = H * W
    x3 = x.reshape(B, C, HW)
    itemsize = jnp.dtype(x.dtype).itemsize
    budget_elems = max(1, _TILE_BYTES // itemsize)

    # Lane tile (multiple of 128, or the full spatial extent).
    if block_lanes is not None:
        max_lanes = max(128, (int(block_lanes) // 128) * 128)
    else:
        max_lanes = max(128, (budget_elems // C) // 128 * 128)
    tw = HW if HW <= max_lanes else max_lanes

    # Batch tile: grow the block toward the VMEM budget when H*W is small.
    tb = min(B, max(1, budget_elems // (C * tw)))
    n_w = pl.cdiv(HW, tw)
    if n_w == 1 and tb >= B and B > 1:
        tb = (B + 1) // 2                         # >= 2 grid blocks for v7x megacore

    param_bytes = (weight.size + bias.size) * jnp.dtype(weight.dtype).itemsize
    cost = _cost(B * C * HW, B * HW, 2 * B * C * HW * itemsize, param_bytes)

    out = pl.pallas_call(
        functools.partial(_ln_chan_kernel, eps=eps),
        out_shape=jax.ShapeDtypeStruct((B, C, HW), x.dtype),
        grid=(pl.cdiv(B, tb), n_w),
        in_specs=[pl.BlockSpec((tb, C, tw), lambda b, j: (b, 0, j)),
                  pl.BlockSpec((1, C, 1), lambda b, j: (0, 0, 0)),
                  pl.BlockSpec((1, C, 1), lambda b, j: (0, 0, 0))],
        out_specs=pl.BlockSpec((tb, C, tw), lambda b, j: (b, 0, j)),
        compiler_params=pltpu.CompilerParams(
            dimension_semantics=("parallel", "parallel"),
            vmem_limit_bytes=_VMEM_LIMIT),
        cost_estimate=cost,
    )(x3, weight.reshape(1, C, 1), bias.reshape(1, C, 1))
    return out.reshape(B, C, H, W)


def layer_norm(x, weight, bias, *, eps=1e-6, data_format="channels_last",
               block_rows=None, block_lanes=None):
    """Forward pass of the PyTorch `LayerNorm` module (both data formats)."""
    if data_format == "channels_last":
        return _layer_norm_channels_last(x, weight, bias, eps, block_rows)
    elif data_format == "channels_first":
        return _layer_norm_channels_first(x, weight, bias, eps, block_lanes)
    raise NotImplementedError(data_format)


# ---------------------------------- main -------------------------------------

if __name__ == "__main__":
    key = jax.random.PRNGKey(0)
    ks = jax.random.split(key, 8)
    eps = 1e-6

    # ---- channels_last, C=32: packed lane-dense path ----
    C = 32
    weight = 1.0 + 0.1 * jax.random.normal(ks[1], (C,), jnp.float32)
    bias = 0.1 * jax.random.normal(ks[2], (C,), jnp.float32)
    x_cl = jax.random.normal(ks[0], (2, 16, 16, C), jnp.float32)
    ln_cl = jax.jit(functools.partial(layer_norm, eps=eps, data_format="channels_last"))
    y_cl = ln_cl(x_cl, weight, bias)
    jax.block_until_ready(y_cl)
    mu = jnp.mean(x_cl, axis=-1, keepdims=True)
    var = jnp.mean((x_cl - mu) ** 2, axis=-1, keepdims=True)
    ref_cl = (x_cl - mu) / jnp.sqrt(var + eps) * weight + bias
    assert y_cl.shape == x_cl.shape
    assert float(jnp.max(jnp.abs(y_cl - ref_cl))) < 1e-4
    assert bool(jnp.all(jnp.isfinite(y_cl)))

    # ---- channels_last, D=128: direct path with a masked tail block (M=126) ----
    D2 = 128
    w2 = 1.0 + 0.1 * jax.random.normal(ks[3], (D2,), jnp.float32)
    b2 = 0.1 * jax.random.normal(ks[4], (D2,), jnp.float32)
    x_cl2 = jax.random.normal(ks[5], (2, 7, 9, D2), jnp.float32)
    y_cl2 = ln_cl(x_cl2, w2, b2)
    jax.block_until_ready(y_cl2)
    mu = jnp.mean(x_cl2, axis=-1, keepdims=True)
    var = jnp.mean((x_cl2 - mu) ** 2, axis=-1, keepdims=True)
    ref_cl2 = (x_cl2 - mu) / jnp.sqrt(var + eps) * w2 + b2
    assert y_cl2.shape == x_cl2.shape
    assert float(jnp.max(jnp.abs(y_cl2 - ref_cl2))) < 1e-4
    assert bool(jnp.all(jnp.isfinite(y_cl2)))

    # ---- channels_first: x[B, C, H, W], normalize over the channel axis ----
    x_cf = jax.random.normal(ks[6], (2, C, 16, 16), jnp.float32)
    ln_cf = jax.jit(functools.partial(layer_norm, eps=eps, data_format="channels_first"))
    y_cf = ln_cf(x_cf, weight, bias)
    jax.block_until_ready(y_cf)
    mu = jnp.mean(x_cf, axis=1, keepdims=True)
    var = jnp.mean((x_cf - mu) ** 2, axis=1, keepdims=True)
    ref_cf = ((x_cf - mu) / jnp.sqrt(var + eps)
              * weight[None, :, None, None] + bias[None, :, None, None])
    assert y_cf.shape == x_cf.shape
    assert float(jnp.max(jnp.abs(y_cf - ref_cf))) < 1e-4
    assert bool(jnp.all(jnp.isfinite(y_cf)))

    # ---- channels_first with odd shapes (B=3 -> masked batch tail block) ----
    x_cf2 = jax.random.normal(ks[7], (3, C, 9, 9), jnp.float32)
    y_cf2 = ln_cf(x_cf2, weight, bias)
    jax.block_until_ready(y_cf2)
    mu = jnp.mean(x_cf2, axis=1, keepdims=True)
    var = jnp.mean((x_cf2 - mu) ** 2, axis=1, keepdims=True)
    ref_cf2 = ((x_cf2 - mu) / jnp.sqrt(var + eps)
               * weight[None, :, None, None] + bias[None, :, None, None])
    assert y_cf2.shape == x_cf2.shape
    assert float(jnp.max(jnp.abs(y_cf2 - ref_cf2))) < 1e-4
    assert bool(jnp.all(jnp.isfinite(y_cf2)))

    print("KERNEL_OK")
</pallas_src>

<mosaic_0001>
module attributes {stable_mosaic.version = 11 : i64} {
  func.func @_ln_rows_packed_kernel(%arg0: i32, %arg1: memref<64x128xf32, #tpu.memory_space<vmem>>, %arg2: memref<1x32xf32, #tpu.memory_space<vmem>>, %arg3: memref<1x32xf32, #tpu.memory_space<vmem>>, %arg4: memref<64x128xf32, #tpu.memory_space<vmem>>) attributes {dimension_semantics = [#tpu.dimension_semantics<parallel>], iteration_bounds = array<i64: 2>, scalar_prefetch = 0 : i64, scratch_operands = 0 : i64, tpu.core_type = #tpu.core_type<tc>, window_params = [{transform_indices = @transform_0, window_bounds = array<i64: 64, 128>}, {pipeline_mode = #tpu.pipeline_mode<synchronous>, transform_indices = @transform_1, window_bounds = array<i64: 1, 32>}, {pipeline_mode = #tpu.pipeline_mode<synchronous>, transform_indices = @transform_2, window_bounds = array<i64: 1, 32>}, {transform_indices = @transform_3, window_bounds = array<i64: 64, 128>}]} {
    %c0 = arith.constant 0 : index
    %c0_0 = arith.constant 0 : index
    %0 = vector.load %arg1[%c0, %c0_0] : memref<64x128xf32, #tpu.memory_space<vmem>>, vector<64x128xf32>
    %c0_1 = arith.constant 0 : index
    %c0_2 = arith.constant 0 : index
    %1 = vector.load %arg2[%c0_1, %c0_2] : memref<1x32xf32, #tpu.memory_space<vmem>>, vector<1x32xf32>
    %c0_3 = arith.constant 0 : index
    %c0_4 = arith.constant 0 : index
    %2 = vector.load %arg3[%c0_3, %c0_4] : memref<1x32xf32, #tpu.memory_space<vmem>>, vector<1x32xf32>
    %3 = vector.extract_strided_slice %0 {offsets = [0, 0], sizes = [64, 32], strides = [1, 1]} : vector<64x128xf32> to vector<64x32xf32>
    %cst = arith.constant dense<0.000000e+00> : vector<64xf32>
    %4 = vector.multi_reduction <add>, %3, %cst [1] : vector<64x32xf32> to vector<64xf32>
    %5 = vector.shape_cast %4 : vector<64xf32> to vector<64x1xf32>
    %cst_5 = arith.constant 3.200000e+01 : f32
    %6 = vector.broadcast %cst_5 : f32 to vector<64x1xf32>
    %7 = arith.divf %5, %6 : vector<64x1xf32>
    %8 = vector.broadcast %7 : vector<64x1xf32> to vector<64x32xf32>
    %9 = arith.subf %3, %8 : vector<64x32xf32>
    %10 = arith.mulf %9, %9 : vector<64x32xf32>
    %cst_6 = arith.constant dense<0.000000e+00> : vector<64xf32>
    %11 = vector.multi_reduction <add>, %10, %cst_6 [1] : vector<64x32xf32> to vector<64xf32>
    %12 = vector.shape_cast %11 : vector<64xf32> to vector<64x1xf32>
    %cst_7 = arith.constant 3.200000e+01 : f32
    %13 = vector.broadcast %cst_7 : f32 to vector<64x1xf32>
    %14 = arith.divf %12, %13 : vector<64x1xf32>
    %cst_8 = arith.constant 9.99999997E-7 : f32
    %15 = vector.broadcast %cst_8 : f32 to vector<64x1xf32>
    %16 = arith.addf %14, %15 : vector<64x1xf32>
    %17 = math.rsqrt %16 : vector<64x1xf32>
    %18 = vector.broadcast %17 : vector<64x1xf32> to vector<64x32xf32>
    %19 = arith.mulf %9, %18 : vector<64x32xf32>
    %20 = vector.broadcast %1 : vector<1x32xf32> to vector<64x32xf32>
    %21 = arith.mulf %19, %20 : vector<64x32xf32>
    %22 = vector.broadcast %2 : vector<1x32xf32> to vector<64x32xf32>
    %23 = arith.addf %21, %22 : vector<64x32xf32>
    %c0_9 = arith.constant 0 : index
    %c0_10 = arith.constant 0 : index
    %24 = vector.load %arg4[%c0_9, %c0_10] : memref<64x128xf32, #tpu.memory_space<vmem>>, vector<64x32xf32>
    tpu.vector_store %arg4[%c0_9, %c0_10], %23 {strides = array<i32>} : memref<64x128xf32, #tpu.memory_space<vmem>>, vector<64x32xf32>,
    %25 = vector.extract_strided_slice %0 {offsets = [0, 32], sizes = [64, 32], strides = [1, 1]} : vector<64x128xf32> to vector<64x32xf32>
    %cst_11 = arith.constant dense<0.000000e+00> : vector<64xf32>
    %26 = vector.multi_reduction <add>, %25, %cst_11 [1] : vector<64x32xf32> to vector<64xf32>
    %27 = vector.shape_cast %26 : vector<64xf32> to vector<64x1xf32>
    %cst_12 = arith.constant 3.200000e+01 : f32
    %28 = vector.broadcast %cst_12 : f32 to vector<64x1xf32>
    %29 = arith.divf %27, %28 : vector<64x1xf32>
    %30 = vector.broadcast %29 : vector<64x1xf32> to vector<64x32xf32>
    %31 = arith.subf %25, %30 : vector<64x32xf32>
    %32 = arith.mulf %31, %31 : vector<64x32xf32>
    %cst_13 = arith.constant dense<0.000000e+00> : vector<64xf32>
    %33 = vector.multi_reduction <add>, %32, %cst_13 [1] : vector<64x32xf32> to vector<64xf32>
    %34 = vector.shape_cast %33 : vector<64xf32> to vector<64x1xf32>
    %cst_14 = arith.constant 3.200000e+01 : f32
    %35 = vector.broadcast %cst_14 : f32 to vector<64x1xf32>
    %36 = arith.divf %34, %35 : vector<64x1xf32>
    %cst_15 = arith.constant 9.99999997E-7 : f32
    %37 = vector.broadcast %cst_15 : f32 to vector<64x1xf32>
    %38 = arith.addf %36, %37 : vector<64x1xf32>
    %39 = math.rsqrt %38 : vector<64x1xf32>
    %40 = vector.broadcast %39 : vector<64x1xf32> to vector<64x32xf32>
    %41 = arith.mulf %31, %40 : vector<64x32xf32>
    %42 = vector.broadcast %1 : vector<1x32xf32> to vector<64x32xf32>
    %43 = arith.mulf %41, %42 : vector<64x32xf32>
    %44 = vector.broadcast %2 : vector<1x32xf32> to vector<64x32xf32>
    %45 = arith.addf %43, %44 : vector<64x32xf32>
    %c0_16 = arith.constant 0 : index
    %c32 = arith.constant 32 : index
    %46 = vector.load %arg4[%c0_16, %c32] : memref<64x128xf32, #tpu.memory_space<vmem>>, vector<64x32xf32>
    tpu.vector_store %arg4[%c0_16, %c32], %45 {strides = array<i32>} : memref<64x128xf32, #tpu.memory_space<vmem>>, vector<64x32xf32>,
    %47 = vector.extract_strided_slice %0 {offsets = [0, 64], sizes = [64, 32], strides = [1, 1]} : vector<64x128xf32> to vector<64x32xf32>
    %cst_17 = arith.constant dense<0.000000e+00> : vector<64xf32>
    %48 = vector.multi_reduction <add>, %47, %cst_17 [1] : vector<64x32xf32> to vector<64xf32>
    %49 = vector.shape_cast %48 : vector<64xf32> to vector<64x1xf32>
    %cst_18 = arith.constant 3.200000e+01 : f32
    %50 = vector.broadcast %cst_18 : f32 to vector<64x1xf32>
    %51 = arith.divf %49, %50 : vector<64x1xf32>
    %52 = vector.broadcast %51 : vector<64x1xf32> to vector<64x32xf32>
    %53 = arith.subf %47, %52 : vector<64x32xf32>
    %54 = arith.mulf %53, %53 : vector<64x32xf32>
    %cst_19 = arith.constant dense<0.000000e+00> : vector<64xf32>
    %55 = vector.multi_reduction <add>, %54, %cst_19 [1] : vector<64x32xf32> to vector<64xf32>
    %56 = vector.shape_cast %55 : vector<64xf32> to vector<64x1xf32>
    %cst_20 = arith.constant 3.200000e+01 : f32
    %57 = vector.broadcast %cst_20 : f32 to vector<64x1xf32>
    %58 = arith.divf %56, %57 : vector<64x1xf32>
    %cst_21 = arith.constant 9.99999997E-7 : f32
    %59 = vector.broadcast %cst_21 : f32 to vector<64x1xf32>
    %60 = arith.addf %58, %59 : vector<64x1xf32>
    %61 = math.rsqrt %60 : vector<64x1xf32>
    %62 = vector.broadcast %61 : vector<64x1xf32> to vector<64x32xf32>
    %63 = arith.mulf %53, %62 : vector<64x32xf32>
    %64 = vector.broadcast %1 : vector<1x32xf32> to vector<64x32xf32>
    %65 = arith.mulf %63, %64 : vector<64x32xf32>
    %66 = vector.broadcast %2 : vector<1x32xf32> to vector<64x32xf32>
    %67 = arith.addf %65, %66 : vector<64x32xf32>
    %c0_22 = arith.constant 0 : index
    %c64 = arith.constant 64 : index
    %68 = vector.load %arg4[%c0_22, %c64] : memref<64x128xf32, #tpu.memory_space<vmem>>, vector<64x32xf32>
    tpu.vector_store %arg4[%c0_22, %c64], %67 {strides = array<i32>} : memref<64x128xf32, #tpu.memory_space<vmem>>, vector<64x32xf32>,
    %69 = vector.extract_strided_slice %0 {offsets = [0, 96], sizes = [64, 32], strides = [1, 1]} : vector<64x128xf32> to vector<64x32xf32>
    %cst_23 = arith.constant dense<0.000000e+00> : vector<64xf32>
    %70 = vector.multi_reduction <add>, %69, %cst_23 [1] : vector<64x32xf32> to vector<64xf32>
    %71 = vector.shape_cast %70 : vector<64xf32> to vector<64x1xf32>
    %cst_24 = arith.constant 3.200000e+01 : f32
    %72 = vector.broadcast %cst_24 : f32 to vector<64x1xf32>
    %73 = arith.divf %71, %72 : vector<64x1xf32>
    %74 = vector.broadcast %73 : vector<64x1xf32> to vector<64x32xf32>
    %75 = arith.subf %69, %74 : vector<64x32xf32>
    %76 = arith.mulf %75, %75 : vector<64x32xf32>
    %cst_25 = arith.constant dense<0.000000e+00> : vector<64xf32>
    %77 = vector.multi_reduction <add>, %76, %cst_25 [1] : vector<64x32xf32> to vector<64xf32>
    %78 = vector.shape_cast %77 : vector<64xf32> to vector<64x1xf32>
    %cst_26 = arith.constant 3.200000e+01 : f32
    %79 = vector.broadcast %cst_26 : f32 to vector<64x1xf32>
    %80 = arith.divf %78, %79 : vector<64x1xf32>
    %cst_27 = arith.constant 9.99999997E-7 : f32
    %81 = vector.broadcast %cst_27 : f32 to vector<64x1xf32>
    %82 = arith.addf %80, %81 : vector<64x1xf32>
    %83 = math.rsqrt %82 : vector<64x1xf32>
    %84 = vector.broadcast %83 : vector<64x1xf32> to vector<64x32xf32>
    %85 = arith.mulf %75, %84 : vector<64x32xf32>
    %86 = vector.broadcast %1 : vector<1x32xf32> to vector<64x32xf32>
    %87 = arith.mulf %85, %86 : vector<64x32xf32>
    %88 = vector.broadcast %2 : vector<1x32xf32> to vector<64x32xf32>
    %89 = arith.addf %87, %88 : vector<64x32xf32>
    %c0_28 = arith.constant 0 : index
    %c96 = arith.constant 96 : index
    %90 = vector.load %arg4[%c0_28, %c96] : memref<64x128xf32, #tpu.memory_space<vmem>>, vector<64x32xf32>
    tpu.vector_store %arg4[%c0_28, %c96], %89 {strides = array<i32>} : memref<64x128xf32, #tpu.memory_space<vmem>>, vector<64x32xf32>,
    return
  }
  func.func @transform_0(%arg0: i32) -> (i32, i32) {
    %c0_i32 = arith.constant 0 : i32
    %c0_i32_0 = arith.constant 0 : i32
    return %arg0, %c0_i32 : i32, i32
  }
  func.func @transform_1(%arg0: i32) -> (i32, i32) {
    %c0_i32 = arith.constant 0 : i32
    %c0_i32_0 = arith.constant 0 : i32
    %c0_i32_1 = arith.constant 0 : i32
    return %c0_i32, %c0_i32_0 : i32, i32
  }
  func.func @transform_2(%arg0: i32) -> (i32, i32) {
    %c0_i32 = arith.constant 0 : i32
    %c0_i32_0 = arith.constant 0 : i32
    %c0_i32_1 = arith.constant 0 : i32
    return %c0_i32, %c0_i32_0 : i32, i32
  }
  func.func @transform_3(%arg0: i32) -> (i32, i32) {
    %c0_i32 = arith.constant 0 : i32
    %c0_i32_0 = arith.constant 0 : i32
    return %arg0, %c0_i32 : i32, i32
  }
}

</mosaic_0001>

<bundles_post_ra>
// kernel: layer_norm.1
= control target key start
LH: loop header
LB: loop body
LE: loop exit
PB: predicated region body
PF: predicated region fallthrough
CT: control target
= control target key end

     0   :  { %s1082_s12 = smov 0   ;;  %s1602_s0 = inlined_call_operand.vmem [shape: f32[128,128], index: 0, kind: input, shape index: {}]   ;;  %s1603_s1 = inlined_call_operand.vmem [shape: f32[1,32], index: 1, kind: input, shape index: {}]   ;;  %s1604_s2 = inlined_call_operand.vmem [shape: f32[1,32], index: 2, kind: input, shape index: {}]   ;;  %s1605_s3 = inlined_call_operand.vmem [shape: f32[128,128], index: 3, kind: output, shape index: {}]  }
   0x1 LB: > { %s963_s13 = sadd.s32 4294967295, %s1057_s12   ;;  %p967_p0 = scmp.ge.s32.totalorder %s1057_s12, 1  ;;  %s1057_s12 = sphi %s1082_s12, %s13_s12  }
   0x2   : > { %p138_p1 = scmp.lt.s32.totalorder %s1057_s12, 3 }
   0x4   : > { %p139_p2 = pnand %p967_p0, %p138_p1 }
   0x5   : > { %s968_s14 = sshll.u32 (!%p139_p2), %s963_s13, 3  ;;  %vm184_vm0 = vcmask (!%p139_p2), 261120   ;;  %s1059_s19 = smov (!%p139_p2), 96   ;;  %vm516_vm1 = vcmask (!%p139_p2), 523520   ;;  %vm707_vm2 = vcmask (!%p139_p2), 785920   ;;  %vm898_vm3 = vcmask (!%p139_p2), 1048320  }
   0x6   : > { %142 = sbr.rel (%p139_p2) target bundleno = 841 (0x349), region = 32  ;;  %p163_p3 = scmp.lt.s32.totalorder (!%p139_p2), %s968_s14, 15 }
   0x7   : > { %s1060_s20 = smov (!%p139_p2), 64   ;;  %s1061_s21 = smov (!%p139_p2), 32  }
   0xd   : > { %s1607_s14 = smov (!%p163_p3, %s968_s14), 15 }
   0xe   : > { %s969_s15 = sshll.u32 %s1607_s14, 3 }
   0xf   : > { %s166_s18 = scalar_lea.vmem %s1602_s0, %s969_s15  ;;  %s1320_s28 = scalar_lea.vmem %s1605_s3, %s969_s15 }
  0x10   : > { %v1098_v0 = vld [vmem:[%s166_s18 + $0x10] sm:$0xff]  ;;  %v1100_v1 = vld [vmem:[%s166_s18] sm:$0xff]  ;;  %v1102_v2 = vld [vmem:[%s166_s18 + $0x18] sm:$0xff] }
  0x11   : > { %v191_v3 = vsel %vm184_vm0, %v1098_v0, 0.0  ;;  %v185_v4 = vsel %vm184_vm0, %v1100_v1, 0.0  ;;  %v1108_v5 = vld [vmem:[%s166_s18 + $0x8] sm:$0xff]  ;;  %v194_v6 = vsel %vm184_vm0, %v1102_v2, 0.0  ;;  %v1116_v9 = vld [vmem:[%s166_s18 + $0x20] sm:$0xff]  ;;  %v1122_v12 = vld [vmem:[%s166_s18 + $0x38] sm:$0xff] }
  0x12   : > { %192 = vadd.xlane.f32.xlu1 %v191_v3  ;;  %186 = vadd.xlane.f32.xlu0 %v185_v4  ;;  %v188_v7 = vsel %vm184_vm0, %v1108_v5, 0.0  ;;  %v1114_v8 = vld [vmem:[%s166_s18 + $0x28] sm:$0xff]  ;;  %v197_v11 = vsel %vm184_vm0, %v1116_v9, 0.0  ;;  %v1124_v13 = vld [vmem:[%s166_s18 + $0x30] sm:$0xff]  ;;  %v206_v14 = vsel %vm184_vm0, %v1122_v12, 0.0 }
  0x13   : > { %v200_v10 = vsel %vm184_vm0, %v1114_v8, 0.0  ;;  %v203_v15 = vsel %vm184_vm0, %v1124_v13, 0.0 }
  0x16   : > { %195 = vadd.xlane.f32.xlu1 %v194_v6  ;;  %189 = vadd.xlane.f32.xlu0 %v188_v7 }
  0x1a   : > { %201 = vadd.xlane.f32.xlu1 %v200_v10  ;;  %198 = vadd.xlane.f32.xlu0 %v197_v11 }
  0x1e   : > { %207 = vadd.xlane.f32.xlu1 %v206_v14  ;;  %204 = vadd.xlane.f32.xlu0 %v203_v15 }
  0x2f   : > { %336 = vrot.lane.b32.xlu1 %v1108_v5, %s1059_s19 }
  0x33   : > { %338 = vrot.lane.b32.xlu1 %v1098_v0, %s1059_s19 }
  0x34   : > { %334 = vrot.lane.b32.xlu0 %v1100_v1, %s1059_s19 }
  0x37   : > { %340 = vrot.lane.b32.xlu1 %v1102_v2, %s1059_s19 }
  0x38   : > { %342 = vrot.lane.b32.xlu0 %v1116_v9, %s1059_s19 }
  0x3b   : > { %344 = vrot.lane.b32.xlu1 %v1114_v8, %s1059_s19 }
  0x3c   : > { %346 = vrot.lane.b32.xlu0 %v1124_v13, %s1059_s19 }
  0x3f   : > { %348 = vrot.lane.b32.xlu1 %v1122_v12, %s1059_s19 }
  0x40   : > { %531 = vrot.lane.b32.xlu0 %v1102_v2, %s1060_s20 }
  0x43   : > { %525 = vrot.lane.b32.xlu1 %v1100_v1, %s1060_s20 }
  0x44   : > { %535 = vrot.lane.b32.xlu0 %v1114_v8, %s1060_s20 }
  0x47   : > { %527 = vrot.lane.b32.xlu1 %v1108_v5, %s1060_s20 }
  0x48   : > { %539 = vrot.lane.b32.xlu0 %v1122_v12, %s1060_s20 }
  0x4b   : > { %529 = vrot.lane.b32.xlu1 %v1098_v0, %s1060_s20 }
  0x4f   : > { %533 = vrot.lane.b32.xlu1 %v1116_v9, %s1060_s20 }
  0x53   : > { %537 = vrot.lane.b32.xlu1 %v1124_v13, %s1060_s20 }
  0x9f   : > { %v193_v16 = vpop.xlane.xlu1 %192  ;;  %v187_v17 = vpop.xlane.xlu0 %186 }
  0xa0   : > { %v210_v40 = vmul.f32 0.03125, %v187_v17  ;;  %v212_v42 = vmul.f32 0.03125, %v193_v16 }
  0xa2   : > { %v1187_v43 = vsub.f32 %v1100_v1, %v210_v40  ;;  %v1193_v46 = vsub.f32 %v1098_v0, %v212_v42 }
  0xa3   : > { %v196_v18 = vpop.xlane.xlu1 %195  ;;  %v190_v19 = vpop.xlane.xlu0 %189 }
  0xa4   : > { %v211_v41 = vmul.f32 0.03125, %v190_v19  ;;  %v213_v44 = vmul.f32 0.03125, %v196_v18  ;;  %v226_v49 = vmul.f32 %v1187_v43, %v1187_v43  ;;  %v228_v56 = vmul.f32 %v1193_v46, %v1193_v46 }
  0xa6   : > { %v1190_v45 = vsub.f32 %v1108_v5, %v211_v41  ;;  %v1196_v47 = vsub.f32 %v1102_v2, %v213_v44  ;;  %v234_v54 = vsel %vm184_vm0, %v226_v49, 0.0  ;;  %v240_v63 = vsel %vm184_vm0, %v228_v56, 0.0 }
  0xa7   : > { %v202_v20 = vpop.xlane.xlu1 %201  ;;  %v199_v21 = vpop.xlane.xlu0 %198 }
  0xa8   : > { %v215_v48 = vmul.f32 0.03125, %v202_v20  ;;  %v214_v50 = vmul.f32 0.03125, %v199_v21  ;;  %v227_v51 = vmul.f32 %v1190_v45, %v1190_v45  ;;  %v229_v55 = vmul.f32 %v1196_v47, %v1196_v47 }
  0xaa   : > { %v1203_v53 = vsub.f32 %v1114_v8, %v215_v48  ;;  %v1211_v57 = vsub.f32 %v1116_v9, %v214_v50  ;;  %v237_v60 = vsel %vm184_vm0, %v227_v51, 0.0  ;;  %v243_v62 = vsel %vm184_vm0, %v229_v55, 0.0 }
  0xab   : > { %v208_v22 = vpop.xlane.xlu1 %207  ;;  %v205_v23 = vpop.xlane.xlu0 %204 }
  0xac   : > { %v217_v58 = vmul.f32 0.03125, %v208_v22  ;;  %v216_v59 = vmul.f32 0.03125, %v205_v23  ;;  %v231_v6 = vmul.f32 %v1203_v53, %v1203_v53  ;;  %v230_v7 = vmul.f32 %v1211_v57, %v1211_v57 }
  0xae   : > { %v1217_v3 = vsub.f32 %v1122_v12, %v217_v58  ;;  %v1220_v4 = vsub.f32 %v1124_v13, %v216_v59  ;;  %v249_v10 = vsel %vm184_vm0, %v231_v6, 0.0  ;;  %v246_v11 = vsel %vm184_vm0, %v230_v7, 0.0 }
  0xaf   : > { %v337_v24 = vpop.permute.xlu1 %336  ;;  %v335_v25 = vpop.permute.xlu0 %334 }
  0xb0   : > { %v361_v26 = vsel %vm184_vm0, %v337_v24, 0.0  ;;  %v358_v27 = vsel %vm184_vm0, %v335_v25, 0.0  ;;  %v233_v14 = vmul.f32 %v1217_v3, %v1217_v3  ;;  %v232_v15 = vmul.f32 %v1220_v4, %v1220_v4 }
  0xb1   : > { %362 = vadd.xlane.f32.xlu1 %v361_v26  ;;  %359 = vadd.xlane.f32.xlu0 %v358_v27 }
  0xb2   : > { %v255_v17 = vsel %vm184_vm0, %v233_v14, 0.0  ;;  %v252_v18 = vsel %vm184_vm0, %v232_v15, 0.0 }
  0xb3   : > { %v339_v28 = vpop.permute.xlu1 %338  ;;  %v343_v30 = vpop.permute.xlu0 %342 }
  0xb4   : > { %v364_v29 = vsel %vm184_vm0, %v339_v28, 0.0  ;;  %v370_v33 = vsel %vm184_vm0, %v343_v30, 0.0 }
  0xb5   : > { %365 = vadd.xlane.f32.xlu0 %v364_v29 }
  0xb7   : > { %v341_v31 = vpop.permute.xlu1 %340  ;;  %v347_v35 = vpop.permute.xlu0 %346 }
  0xb8   : > { %v367_v32 = vsel %vm184_vm0, %v341_v31, 0.0  ;;  %v376_v37 = vsel %vm184_vm0, %v347_v35, 0.0 }
  0xb9   : > { %368 = vadd.xlane.f32.xlu0 %v367_v32 }
  0xbb   : > { %v345_v34 = vpop.permute.xlu1 %344  ;;  %v532_v22 = vpop.permute.xlu0 %531 }
  0xbc   : > { %v373_v36 = vsel %vm184_vm0, %v345_v34, 0.0  ;;  %v558_v28 = vsel %vm184_vm0, %v532_v22, 0.0 }
  0xbd   : > { %374 = vadd.xlane.f32.xlu1 %v373_v36  ;;  %371 = vadd.xlane.f32.xlu0 %v370_v33 }
  0xbf   : > { %v349_v38 = vpop.permute.xlu1 %348  ;;  %v536_v26 = vpop.permute.xlu0 %535 }
  0xc0   : > { %v379_v39 = vsel %vm184_vm0, %v349_v38, 0.0  ;;  %v564_v29 = vsel %vm184_vm0, %v536_v26, 0.0 }
  0xc1   : > { %380 = vadd.xlane.f32.xlu1 %v379_v39  ;;  %377 = vadd.xlane.f32.xlu0 %v376_v37 }
  0xc3   : > { %v526_v52 = vpop.permute.xlu1 %525  ;;  %v540_v30 = vpop.permute.xlu0 %539 }
  0xc4   : > { %v549_v20 = vsel %vm184_vm0, %v526_v52, 0.0  ;;  %v570_v31 = vsel %vm184_vm0, %v540_v30, 0.0 }
  0xc7   : > { %v528_v61 = vpop.permute.xlu1 %527 }
  0xc8   : > { %v552_v21 = vsel %vm184_vm0, %v528_v61, 0.0 }
  0xcb   : > { %v530_v16 = vpop.permute.xlu1 %529 }
  0xcc   : > { %v555_v24 = vsel %vm184_vm0, %v530_v16, 0.0  ;;  %v1268_v16 = vld [vmem:[%s1603_s1] ss:$0 sm:$0xff] }
  0xcf   : > { %v534_v19 = vpop.permute.xlu1 %533 }
  0xd0   : > { %v561_v23 = vsel %vm184_vm0, %v534_v19, 0.0 }
  0xd2   : > { %716 = vrot.lane.b32.xlu1 %v1100_v1, %s1061_s21 }
  0xd3   : > { %v538_v25 = vpop.permute.xlu1 %537 }
  0xd4   : > { %v567_v27 = vsel %vm184_vm0, %v538_v25, 0.0 }
  0xd6   : > { %720 = vrot.lane.b32.xlu1 %v1098_v0, %s1061_s21 }
  0xd7   : > { %718 = vrot.lane.b32.xlu0 %v1108_v5, %s1061_s21 }
  0xda   : > { %724 = vrot.lane.b32.xlu1 %v1116_v9, %s1061_s21 }
  0xdb   : > { %722 = vrot.lane.b32.xlu0 %v1102_v2, %s1061_s21 }
  0xde   : > { %728 = vrot.lane.b32.xlu1 %v1124_v13, %s1061_s21 }
  0xdf   : > { %726 = vrot.lane.b32.xlu0 %v1114_v8, %s1061_s21 }
  0xe3   : > { %730 = vrot.lane.b32.xlu0 %v1122_v12, %s1061_s21 }
 0x102   : > { %238 = vadd.xlane.f32.xlu1 %v237_v60  ;;  %235 = vadd.xlane.f32.xlu0 %v234_v54 }
 0x106   : > { %244 = vadd.xlane.f32.xlu1 %v243_v62  ;;  %241 = vadd.xlane.f32.xlu0 %v240_v63  ;;  %v1253_v63 = vld [vmem:[%s1604_s2] ss:$0 sm:$0xff] }
 0x10a   : > { %250 = vadd.xlane.f32.xlu1 %v249_v10  ;;  %247 = vadd.xlane.f32.xlu0 %v246_v11 }
 0x10e   : > { %256 = vadd.xlane.f32.xlu1 %v255_v17  ;;  %253 = vadd.xlane.f32.xlu0 %v252_v18 }
 0x112   : > { %550 = vadd.xlane.f32.xlu1 %v549_v20  ;;  %553 = vadd.xlane.f32.xlu0 %v552_v21 }
 0x116   : > { %562 = vadd.xlane.f32.xlu1 %v561_v23  ;;  %556 = vadd.xlane.f32.xlu0 %v555_v24 }
 0x11a   : > { %568 = vadd.xlane.f32.xlu1 %v567_v27  ;;  %559 = vadd.xlane.f32.xlu0 %v558_v28 }
 0x11e   : > { %565 = vadd.xlane.f32.xlu0 %v564_v29 }
 0x122   : > { %571 = vadd.xlane.f32.xlu0 %v570_v31 }
 0x13e   : > { %v360_v32 = vpop.xlane.xlu0 %359  ;;  %v363_v34 = vpop.xlane.xlu1 %362 }
 0x13f   : > { %v383_v62 = vmul.f32 0.03125, %v363_v34  ;;  %v382_v10 = vmul.f32 0.03125, %v360_v32 }
 0x141   : > { %v1256_v6 = vsub.f32 %v1108_v5, %v383_v62  ;;  %v1271_v17 = vsub.f32 %v1100_v1, %v382_v10 }
 0x142   : > { %v366_v33 = vpop.xlane.xlu0 %365 }
 0x143   : > { %v399_v15 = vmul.f32 %v1256_v6, %v1256_v6  ;;  %v384_v18 = vmul.f32 0.03125, %v366_v33  ;;  %v398_v24 = vmul.f32 %v1271_v17, %v1271_v17 }
 0x145   : > { %v1282_v22 = vsub.f32 %v1098_v0, %v384_v18 }
 0x146   : > { %v369_v35 = vpop.xlane.xlu0 %368 }
 0x147   : > { %v385_v7 = vmul.f32 0.03125, %v369_v35  ;;  %v400_v29 = vmul.f32 %v1282_v22, %v1282_v22 }
 0x149   : > { %v1261_v11 = vsub.f32 %v1102_v2, %v385_v7 }
 0x14a   : > { %v375_v36 = vpop.xlane.xlu1 %374  ;;  %v372_v37 = vpop.xlane.xlu0 %371 }
 0x14b   : > { %v387_v14 = vmul.f32 0.03125, %v375_v36  ;;  %v401_v21 = vmul.f32 %v1261_v11, %v1261_v11  ;;  %v386_v23 = vmul.f32 0.03125, %v372_v37 }
 0x14d   : > { %v1277_v19 = vsub.f32 %v1114_v8, %v387_v14  ;;  %v1294_v27 = vsub.f32 %v1116_v9, %v386_v23 }
 0x14e   : > { %v381_v38 = vpop.xlane.xlu1 %380  ;;  %v378_v39 = vpop.xlane.xlu0 %377 }
 0x14f   : > { %v389_v20 = vmul.f32 0.03125, %v381_v38  ;;  %v403_v26 = vmul.f32 %v1277_v19, %v1277_v19  ;;  %v388_v28 = vmul.f32 0.03125, %v378_v39  ;;  %v402_v32 = vmul.f32 %v1294_v27, %v1294_v27 }
 0x151   : > { %v1289_v25 = vsub.f32 %v1122_v12, %v389_v20  ;;  %v1303_v31 = vsub.f32 %v1124_v13, %v388_v28 }
 0x152   : > { %v717_v40 = vpop.permute.xlu1 %716  ;;  %v719_v41 = vpop.permute.xlu0 %718 }
 0x153   : > { %v740_v42 = vsel %vm184_vm0, %v717_v40, 0.0  ;;  %v743_v44 = vsel %vm184_vm0, %v719_v41, 0.0  ;;  %v405_v30 = vmul.f32 %v1289_v25, %v1289_v25  ;;  %v404_v33 = vmul.f32 %v1303_v31, %v1303_v31 }
 0x154   : > { %741 = vadd.xlane.f32.xlu1 %v740_v42  ;;  %744 = vadd.xlane.f32.xlu0 %v743_v44 }
 0x156   : > { %v721_v48 = vpop.permute.xlu1 %720  ;;  %v723_v49 = vpop.permute.xlu0 %722 }
 0x157   : > { %v746_v50 = vsel %vm184_vm0, %v721_v48, 0.0  ;;  %v749_v51 = vsel %vm184_vm0, %v723_v49, 0.0 }
 0x158   : > { %747 = vadd.xlane.f32.xlu1 %v746_v50  ;;  %750 = vadd.xlane.f32.xlu0 %v749_v51 }
 0x15a   : > { %v725_v52 = vpop.permute.xlu1 %724  ;;  %v727_v54 = vpop.permute.xlu0 %726 }
 0x15b   : > { %v752_v55 = vsel %vm184_vm0, %v725_v52, 0.0  ;;  %v755_v56 = vsel %vm184_vm0, %v727_v54, 0.0 }
 0x15c   : > { %753 = vadd.xlane.f32.xlu1 %v752_v55  ;;  %756 = vadd.xlane.f32.xlu0 %v755_v56 }
 0x15e   : > { %v729_v58 = vpop.permute.xlu1 %728  ;;  %v731_v59 = vpop.permute.xlu0 %730 }
 0x15f   : > { %v758_v60 = vsel %vm184_vm0, %v729_v58, 0.0  ;;  %v761_v61 = vsel %vm184_vm0, %v731_v59, 0.0 }
 0x160   : > { %759 = vadd.xlane.f32.xlu1 %v758_v60  ;;  %762 = vadd.xlane.f32.xlu0 %v761_v61 }
 0x171   : > { %505 = vrot.lane.b32.xlu1 %v1253_v63, %s1061_s21 }
 0x175   : > { %416 = vrot.lane.b32.xlu1 %v399_v15, %s1059_s19 }
 0x176   : > { %494 = vrot.lane.b32.xlu0 %v1268_v16, %s1061_s21 }
 0x179   : > { %420 = vrot.lane.b32.xlu1 %v401_v21, %s1059_s19 }
 0x17a   : > { %414 = vrot.lane.b32.xlu0 %v398_v24, %s1059_s19 }
 0x17d   : > { %424 = vrot.lane.b32.xlu1 %v403_v26, %s1059_s19 }
 0x17e   : > { %418 = vrot.lane.b32.xlu0 %v400_v29, %s1059_s19 }
 0x181   : > { %428 = vrot.lane.b32.xlu1 %v405_v30, %s1059_s19 }
 0x182   : > { %422 = vrot.lane.b32.xlu0 %v402_v32, %s1059_s19 }
 0x186   : > { %426 = vrot.lane.b32.xlu0 %v404_v33, %s1059_s19 }
 0x18f   : > { %v239_v34 = vpop.xlane.xlu1 %238  ;;  %v236_v35 = vpop.xlane.xlu0 %235 }
 0x190   : > { %v259_v36 = vmul.f32 0.03125, %v239_v34  ;;  %v258_v37 = vmul.f32 0.03125, %v236_v35 }
 0x192   : > { %v267_v38 = vadd.f32 1e-06, %v259_v36  ;;  %v266_v39 = vadd.f32 1e-06, %v258_v37 }
 0x193   : > { %v245_v40 = vpop.xlane.xlu1 %244  ;;  %v242_v41 = vpop.xlane.xlu0 %241 }
 0x194   : > { %987 = vrsqrt.f32 %v267_v38  ;;  %v261_v42 = vmul.f32 0.03125, %v245_v40  ;;  %v260_v44 = vmul.f32 0.03125, %v242_v41 }
 0x195   : > { %989 = vrsqrt.f32 %v266_v39 }
 0x196   : > { %v269_v48 = vadd.f32 1e-06, %v261_v42  ;;  %v268_v49 = vadd.f32 1e-06, %v260_v44 }
 0x197   : > { %v251_v50 = vpop.xlane.xlu1 %250  ;;  %v248_v51 = vpop.xlane.xlu0 %247 }
 0x198   : > { %991 = vrsqrt.f32 %v269_v48  ;;  %v263_v52 = vmul.f32 0.03125, %v251_v50  ;;  %v262_v54 = vmul.f32 0.03125, %v248_v51 }
 0x199   : > { %993 = vrsqrt.f32 %v268_v49 }
 0x19a   : > { %v271_v55 = vadd.f32 1e-06, %v263_v52  ;;  %v270_v56 = vadd.f32 1e-06, %v262_v54 }
 0x19b   : > { %v257_v58 = vpop.xlane.xlu1 %256  ;;  %v254_v59 = vpop.xlane.xlu0 %253 }
 0x19c   : > { %995 = vrsqrt.f32 %v271_v55  ;;  %v265_v60 = vmul.f32 0.03125, %v257_v58  ;;  %v264_v61 = vmul.f32 0.03125, %v254_v59 }
 0x19d   : > { %997 = vrsqrt.f32 %v270_v56 }
 0x19e   : > { %v988_v62 = vpop.eup %987  ;;  %v273_v7 = vadd.f32 1e-06, %v265_v60  ;;  %v272_v10 = vadd.f32 1e-06, %v264_v61 }
 0x19f   : > { %v990_v14 = vpop.eup %989  ;;  %v283_v15 = vmul.f32 %v988_v62, %v1190_v45  ;;  %v551_v18 = vpop.xlane.xlu1 %550 }
 0x1a0   : > { %v554_v20 = vpop.xlane.xlu0 %553  ;;  %v282_v21 = vmul.f32 %v990_v14, %v1187_v43  ;;  %999 = vrsqrt.f32 %v273_v7  ;;  %v573_v23 = vmul.f32 0.03125, %v551_v18 }
 0x1a1   : > { %v574_v24 = vmul.f32 0.03125, %v554_v20  ;;  %v297_v26 = vmul.f32 %v1268_v16, %v283_v15  ;;  %1001 = vrsqrt.f32 %v272_v10 }
 0x1a2   : > { %v992_v28 = vpop.eup %991  ;;  %v296_v45 = vmul.f32 %v1268_v16, %v282_v21  ;;  %v1324_v29 = vsub.f32 %v1100_v1, %v573_v23 }
 0x1a3   : > { %v994_v43 = vpop.eup %993  ;;  %v311_v30 = vadd.f32 %v1253_v63, %v297_v26  ;;  %v285_v32 = vmul.f32 %v992_v28, %v1196_v47  ;;  %v563_v33 = vpop.xlane.xlu1 %562  ;;  %v1331_v37 = vsub.f32 %v1108_v5, %v574_v24 }
 0x1a4   : > { %v557_v34 = vpop.xlane.xlu0 %556  ;;  %v310_v35 = vadd.f32 %v1253_v63, %v296_v45  ;;  %v284_v36 = vmul.f32 %v994_v43, %v1193_v46  ;;  %v577_v40 = vmul.f32 0.03125, %v563_v33  ;;  %v589_v41 = vmul.f32 %v1324_v29, %v1324_v29 }
 0x1a5   : > { %v575_v38 = vmul.f32 0.03125, %v557_v34  ;;  %319 = vst.msk [vmem:[%s1320_s28 + $0x8] sm:$0xff] %vm184_vm0, %v311_v30  ;;  %v299_v39 = vmul.f32 %v1268_v16, %v285_v32  ;;  %v590_v56 = vmul.f32 %v1331_v37, %v1331_v37 }
 0x1a6   : > { %v996_v47 = vpop.eup %995  ;;  %318 = vst.msk [vmem:[%s1320_s28] sm:$0xff] %vm184_vm0, %v310_v35  ;;  %v298_v42 = vmul.f32 %v1268_v16, %v284_v36  ;;  %605 = vrot.lane.b32.xlu1 %v589_v41, %s1060_s20  ;;  %v1355_v59 = vsub.f32 %v1116_v9, %v577_v40 }
 0x1a7   : > { %v1342_v46 = vsub.f32 %v1098_v0, %v575_v38  ;;  %v998_v44 = vpop.eup %997  ;;  %v313_v48 = vadd.f32 %v1253_v63, %v299_v39  ;;  %v287_v49 = vmul.f32 %v996_v47, %v1203_v53  ;;  %v569_v50 = vpop.xlane.xlu1 %568 }
 0x1a8   : > { %v560_v51 = vpop.xlane.xlu0 %559  ;;  %v312_v52 = vadd.f32 %v1253_v63, %v298_v42  ;;  %v286_v54 = vmul.f32 %v998_v44, %v1211_v57  ;;  %v579_v53 = vmul.f32 0.03125, %v569_v50  ;;  %v593_v26 = vmul.f32 %v1355_v59, %v1355_v59 }
 0x1a9   : > { %v576_v55 = vmul.f32 0.03125, %v560_v51  ;;  %321 = vst.msk [vmem:[%s1320_s28 + $0x18] sm:$0xff] %vm184_vm0, %v313_v48  ;;  %v301_v58 = vmul.f32 %v1268_v16, %v287_v49  ;;  %v591_v60 = vmul.f32 %v1342_v46, %v1342_v46 }
 0x1aa   : > { %v1000_v61 = vpop.eup %999  ;;  %320 = vst.msk [vmem:[%s1320_s28 + $0x10] sm:$0xff] %vm184_vm0, %v312_v52  ;;  %v300_v57 = vmul.f32 %v1268_v16, %v286_v54  ;;  %607 = vrot.lane.b32.xlu1 %v590_v56, %s1060_s20 }
 0x1ab   : > { %v1363_v62 = vsub.f32 %v1102_v2, %v576_v55  ;;  %v1002_v7 = vpop.eup %1001  ;;  %v315_v10 = vadd.f32 %v1253_v63, %v301_v58  ;;  %v289_v14 = vmul.f32 %v1000_v61, %v1217_v3  ;;  %609 = vrot.lane.b32.xlu0 %v591_v60, %s1060_s20  ;;  %v1377_v3 = vsub.f32 %v1124_v13, %v579_v53 }
 0x1ac   : > { %v566_v15 = vpop.xlane.xlu0 %565  ;;  %v314_v18 = vadd.f32 %v1253_v63, %v300_v57  ;;  %v288_v20 = vmul.f32 %v1002_v7, %v1220_v4 }
 0x1ad   : > { %v578_v21 = vmul.f32 0.03125, %v566_v15  ;;  %v592_v23 = vmul.f32 %v1363_v62, %v1363_v62  ;;  %323 = vst.msk [vmem:[%s1320_s28 + $0x28] sm:$0xff] %vm184_vm0, %v315_v10  ;;  %v303_v24 = vmul.f32 %v1268_v16, %v289_v14  ;;  %v595_v34 = vmul.f32 %v1377_v3, %v1377_v3 }
 0x1ae   : > { %322 = vst.msk [vmem:[%s1320_s28 + $0x20] sm:$0xff] %vm184_vm0, %v314_v18  ;;  %v302_v4 = vmul.f32 %v1268_v16, %v288_v20 }
 0x1af   : > { %v1385_v28 = vsub.f32 %v1114_v8, %v578_v21  ;;  %v317_v45 = vadd.f32 %v1253_v63, %v303_v24  ;;  %613 = vrot.lane.b32.xlu0 %v593_v26, %s1060_s20  ;;  %611 = vrot.lane.b32.xlu1 %v592_v23, %s1060_s20 }
 0x1b0   : > { %v572_v43 = vpop.xlane.xlu0 %571  ;;  %v316_v30 = vadd.f32 %v1253_v63, %v302_v4 }
 0x1b1   : > { %v580_v32 = vmul.f32 0.03125, %v572_v43  ;;  %v594_v33 = vmul.f32 %v1385_v28, %v1385_v28  ;;  %325 = vst.msk [vmem:[%s1320_s28 + $0x38] sm:$0xff] %vm184_vm0, %v317_v45 }
 0x1b2   : > { %324 = vst.msk [vmem:[%s1320_s28 + $0x30] sm:$0xff] %vm184_vm0, %v316_v30 }
 0x1b3   : > { %v1400_v35 = vsub.f32 %v1122_v12, %v580_v32  ;;  %617 = vrot.lane.b32.xlu0 %v595_v34, %s1060_s20  ;;  %615 = vrot.lane.b32.xlu1 %v594_v33, %s1060_s20 }
 0x1b5   : > { %v596_v36 = vmul.f32 %v1400_v35, %v1400_v35 }
 0x1b7   : > { %619 = vrot.lane.b32.xlu1 %v596_v36, %s1060_s20 }
 0x1e1   : > { %v742_v38 = vpop.xlane.xlu1 %741  ;;  %v745_v39 = vpop.xlane.xlu0 %744 }
 0x1e2   : > { %v764_v40 = vmul.f32 0.03125, %v742_v38  ;;  %v765_v41 = vmul.f32 0.03125, %v745_v39 }
 0x1e4   : > { %v1408_v47 = vsub.f32 %v1100_v1, %v764_v40  ;;  %v1411_v42 = vsub.f32 %v1108_v5, %v765_v41 }
 0x1e5   : > { %v748_v44 = vpop.xlane.xlu1 %747  ;;  %v751_v48 = vpop.xlane.xlu0 %750 }
 0x1e6   : > { %v766_v49 = vmul.f32 0.03125, %v748_v44  ;;  %v767_v50 = vmul.f32 0.03125, %v751_v48  ;;  %v780_v51 = vmul.f32 %v1408_v47, %v1408_v47  ;;  %v781_v52 = vmul.f32 %v1411_v42, %v1411_v42 }
 0x1e8   : > { %v1418_v54 = vsub.f32 %v1098_v0, %v766_v49  ;;  %v1421_v55 = vsub.f32 %v1102_v2, %v767_v50  ;;  %796 = vrot.lane.b32.xlu0 %v780_v51, %s1061_s21  ;;  %798 = vrot.lane.b32.xlu1 %v781_v52, %s1061_s21 }
 0x1e9   : > { %v754_v1 = vpop.xlane.xlu1 %753  ;;  %v757_v5 = vpop.xlane.xlu0 %756 }
 0x1ea   : > { %v768_v56 = vmul.f32 0.03125, %v754_v1  ;;  %v769_v58 = vmul.f32 0.03125, %v757_v5  ;;  %v782_v53 = vmul.f32 %v1418_v54, %v1418_v54  ;;  %v783_v60 = vmul.f32 %v1421_v55, %v1421_v55 }
 0x1ec   : > { %v1430_v0 = vsub.f32 %v1116_v9, %v768_v56  ;;  %v1433_v2 = vsub.f32 %v1114_v8, %v769_v58  ;;  %800 = vrot.lane.b32.xlu0 %v782_v53, %s1061_s21  ;;  %802 = vrot.lane.b32.xlu1 %v783_v60, %s1061_s21 }
 0x1ed   : > { %v760_v61 = vpop.xlane.xlu1 %759  ;;  %v763_v57 = vpop.xlane.xlu0 %762 }
 0x1ee   : > { %v770_v7 = vmul.f32 0.03125, %v760_v61  ;;  %v771_v10 = vmul.f32 0.03125, %v763_v57  ;;  %v784_v14 = vmul.f32 %v1430_v0, %v1430_v0  ;;  %v785_v15 = vmul.f32 %v1433_v2, %v1433_v2 }
 0x1f0   : > { %v1442_v9 = vsub.f32 %v1124_v13, %v770_v7  ;;  %v1445_v8 = vsub.f32 %v1122_v12, %v771_v10  ;;  %804 = vrot.lane.b32.xlu0 %v784_v14, %s1061_s21  ;;  %806 = vrot.lane.b32.xlu1 %v785_v15, %s1061_s21 }
 0x1f1   : > { %v1457_v13 = vpop.permute.xlu1 %505  ;;  %v1459_v21 = vpop.permute.xlu0 %494 }
 0x1f2   : > { %v786_v18 = vmul.f32 %v1442_v9, %v1442_v9  ;;  %v787_v20 = vmul.f32 %v1445_v8, %v1445_v8 }
 0x1f4   : > { %808 = vrot.lane.b32.xlu0 %v786_v18, %s1061_s21  ;;  %810 = vrot.lane.b32.xlu1 %v787_v20, %s1061_s21 }
 0x1f5   : > { %v417_v12 = vpop.permute.xlu1 %416  ;;  %v415_v24 = vpop.permute.xlu0 %414 }
 0x1f6   : > { %v438_v43 = vsel %vm184_vm0, %v415_v24, 0.0  ;;  %v441_v30 = vsel %vm184_vm0, %v417_v12, 0.0 }
 0x1f8   : > { %685 = vrot.lane.b32.xlu0 %v1268_v16, %s1060_s20 }
 0x1f9   : > { %v421_v23 = vpop.permute.xlu1 %420  ;;  %v419_v4 = vpop.permute.xlu0 %418 }
 0x1fa   : > { %v444_v34 = vsel %vm184_vm0, %v419_v4, 0.0  ;;  %v447_v36 = vsel %vm184_vm0, %v421_v23, 0.0 }
 0x1fd   : > { %v425_v26 = vpop.permute.xlu1 %424  ;;  %v423_v32 = vpop.permute.xlu0 %422 }
 0x1fe   : > { %v450_v39 = vsel %vm184_vm0, %v423_v32, 0.0  ;;  %v453_v41 = vsel %vm184_vm0, %v425_v26, 0.0 }
 0x201   : > { %v429_v45 = vpop.permute.xlu1 %428  ;;  %v427_v40 = vpop.permute.xlu0 %426 }
 0x202   : > { %v456_v48 = vsel %vm184_vm0, %v427_v40, 0.0  ;;  %v459_v49 = vsel %vm184_vm0, %v429_v45, 0.0 }
 0x217   : > { %439 = vadd.xlane.f32.xlu0 %v438_v43 }
 0x218   : > { %442 = vadd.xlane.f32.xlu1 %v441_v30  ;;  %v606_v33 = vpop.permute.xlu1 %605 }
 0x219   : > { %v629_v50 = vsel %vm184_vm0, %v606_v33, 0.0 }
 0x21b   : > { %445 = vadd.xlane.f32.xlu0 %v444_v34 }
 0x21c   : > { %448 = vadd.xlane.f32.xlu1 %v447_v36  ;;  %v608_v38 = vpop.permute.xlu1 %607 }
 0x21d   : > { %v632_v52 = vsel %vm184_vm0, %v608_v38, 0.0  ;;  %v610_v1 = vpop.permute.xlu0 %609 }
 0x21e   : > { %v635_v5 = vsel %vm184_vm0, %v610_v1, 0.0 }
 0x21f   : > { %451 = vadd.xlane.f32.xlu0 %v450_v39 }
 0x220   : > { %454 = vadd.xlane.f32.xlu1 %v453_v41 }
 0x221   : > { %v612_v44 = vpop.permute.xlu1 %611  ;;  %v614_v53 = vpop.permute.xlu0 %613 }
 0x222   : > { %v638_v60 = vsel %vm184_vm0, %v612_v44, 0.0  ;;  %v641_v57 = vsel %vm184_vm0, %v614_v53, 0.0 }
 0x223   : > { %457 = vadd.xlane.f32.xlu0 %v456_v48 }
 0x224   : > { %460 = vadd.xlane.f32.xlu1 %v459_v49 }
 0x225   : > { %v616_v51 = vpop.permute.xlu1 %615  ;;  %v618_v7 = vpop.permute.xlu0 %617 }
 0x226   : > { %v644_v56 = vsel %vm184_vm0, %v616_v51, 0.0  ;;  %v647_v10 = vsel %vm184_vm0, %v618_v7, 0.0 }
 0x227   : > { %630 = vadd.xlane.f32.xlu0 %v629_v50 }
 0x228   : > { %633 = vadd.xlane.f32.xlu1 %v632_v52 }
 0x229   : > { %v620_v58 = vpop.permute.xlu1 %619 }
 0x22a   : > { %v650_v61 = vsel %vm184_vm0, %v620_v58, 0.0 }
 0x22b   : > { %636 = vadd.xlane.f32.xlu0 %v635_v5 }
 0x22c   : > { %645 = vadd.xlane.f32.xlu1 %v644_v56 }
 0x22f   : > { %639 = vadd.xlane.f32.xlu0 %v638_v60 }
 0x230   : > { %651 = vadd.xlane.f32.xlu1 %v650_v61 }
 0x233   : > { %642 = vadd.xlane.f32.xlu0 %v641_v57 }
 0x237   : > { %648 = vadd.xlane.f32.xlu0 %v647_v10 }
 0x25a   : > { %v797_v14 = vpop.permute.xlu0 %796  ;;  %v799_v15 = vpop.permute.xlu1 %798 }
 0x25b   : > { %v820_v18 = vsel %vm184_vm0, %v797_v14, 0.0  ;;  %v823_v20 = vsel %vm184_vm0, %v799_v15, 0.0 }
 0x25c   : > { %821 = vadd.xlane.f32.xlu1 %v820_v18 }
 0x25e   : > { %v801_v12 = vpop.permute.xlu0 %800  ;;  %v803_v26 = vpop.permute.xlu1 %802 }
 0x25f   : > { %v826_v23 = vsel %vm184_vm0, %v801_v12, 0.0  ;;  %v829_v4 = vsel %vm184_vm0, %v803_v26, 0.0 }
 0x260   : > { %824 = vadd.xlane.f32.xlu1 %v823_v20 }
 0x262   : > { %v805_v24 = vpop.permute.xlu0 %804  ;;  %v807_v32 = vpop.permute.xlu1 %806 }
 0x263   : > { %v832_v30 = vsel %vm184_vm0, %v805_v24, 0.0  ;;  %v835_v33 = vsel %vm184_vm0, %v807_v32, 0.0 }
 0x264   : > { %827 = vadd.xlane.f32.xlu1 %v826_v23 }
 0x266   : > { %v809_v45 = vpop.permute.xlu0 %808  ;;  %v811_v36 = vpop.permute.xlu1 %810 }
 0x267   : > { %v838_v43 = vsel %vm184_vm0, %v809_v45, 0.0  ;;  %v841_v38 = vsel %vm184_vm0, %v811_v36, 0.0 }
 0x268   : > { %830 = vadd.xlane.f32.xlu1 %v829_v4  ;;  %839 = vadd.xlane.f32.xlu0 %v838_v43 }
 0x26a   : > { %v1486_v34 = vpop.permute.xlu0 %685 }
 0x26c   : > { %833 = vadd.xlane.f32.xlu1 %v832_v30 }
 0x270   : > { %836 = vadd.xlane.f32.xlu1 %v835_v33 }
 0x281   : > { %876 = vrot.lane.b32.xlu1 %v1268_v16, %s1059_s19 }
 0x2a4   : > { %v440_v39 = vpop.xlane.xlu0 %439 }
 0x2a5   : > { %v462_v40 = vmul.f32 0.03125, %v440_v39  ;;  %v443_v41 = vpop.xlane.xlu1 %442  ;;  %842 = vadd.xlane.f32.xlu1 %v841_v38 }
 0x2a6   : > { %v463_v44 = vmul.f32 0.03125, %v443_v41 }
 0x2a7   : > { %v470_v48 = vadd.f32 1e-06, %v462_v40 }
 0x2a8   : > { %v471_v49 = vadd.f32 1e-06, %v463_v44  ;;  %v446_v50 = vpop.xlane.xlu0 %445 }
 0x2a9   : > { %1003 = vrsqrt.f32 %v470_v48  ;;  %v464_v51 = vmul.f32 0.03125, %v446_v50  ;;  %v449_v52 = vpop.xlane.xlu1 %448 }
 0x2aa   : > { %1005 = vrsqrt.f32 %v471_v49  ;;  %v465_v1 = vmul.f32 0.03125, %v449_v52 }
 0x2ab   : > { %v472_v5 = vadd.f32 1e-06, %v464_v51 }
 0x2ac   : > { %v473_v16 = vadd.f32 1e-06, %v465_v1  ;;  %v452_v56 = vpop.xlane.xlu0 %451 }
 0x2ad   : > { %1007 = vrsqrt.f32 %v472_v5  ;;  %v466_v58 = vmul.f32 0.03125, %v452_v56  ;;  %v455_v53 = vpop.xlane.xlu1 %454 }
 0x2ae   : > { %1009 = vrsqrt.f32 %v473_v16  ;;  %v467_v60 = vmul.f32 0.03125, %v455_v53 }
 0x2af   : > { %v474_v61 = vadd.f32 1e-06, %v466_v58 }
 0x2b0   : > { %v475_v57 = vadd.f32 1e-06, %v467_v60  ;;  %v458_v7 = vpop.xlane.xlu0 %457 }
 0x2b1   : > { %1011 = vrsqrt.f32 %v474_v61  ;;  %v468_v10 = vmul.f32 0.03125, %v458_v7  ;;  %v461_v14 = vpop.xlane.xlu1 %460 }
 0x2b2   : > { %1013 = vrsqrt.f32 %v475_v57  ;;  %v469_v15 = vmul.f32 0.03125, %v461_v14 }
 0x2b3   : > { %v1004_v18 = vpop.eup %1003  ;;  %v476_v20 = vadd.f32 1e-06, %v468_v10 }
 0x2b4   : > { %v1006_v12 = vpop.eup %1005  ;;  %v486_v23 = vmul.f32 %v1004_v18, %v1271_v17  ;;  %v477_v24 = vadd.f32 1e-06, %v469_v15 }
 0x2b5   : > { %v487_v26 = vmul.f32 %v1006_v12, %v1256_v6  ;;  %1015 = vrsqrt.f32 %v476_v20 }
 0x2b6   : > { %v497_v4 = vmul.f32 %v1459_v21, %v486_v23  ;;  %1017 = vrsqrt.f32 %v477_v24  ;;  %696 = vrot.lane.b32.xlu1 %v1253_v63, %s1060_s20 }
 0x2b7   : > { %v1008_v45 = vpop.eup %1007  ;;  %v498_v43 = vmul.f32 %v1459_v21, %v487_v26 }
 0x2b8   : > { %v1010_v30 = vpop.eup %1009  ;;  %v508_v32 = vadd.f32 %v1457_v13, %v497_v4  ;;  %v488_v17 = vmul.f32 %v1008_v45, %v1282_v22 }
 0x2b9   : > { %v509_v6 = vadd.f32 %v1457_v13, %v498_v43  ;;  %v489_v33 = vmul.f32 %v1010_v30, %v1261_v11 }
 0x2ba   : > { %517 = vst.msk [vmem:[%s1320_s28] sm:$0xff] %vm516_vm1, %v508_v32  ;;  %v499_v36 = vmul.f32 %v1459_v21, %v488_v17  ;;  %887 = vrot.lane.b32.xlu1 %v1253_v63, %s1059_s19 }
 0x2bb   : > { %v1012_v38 = vpop.eup %1011  ;;  %518 = vst.msk [vmem:[%s1320_s28 + $0x8] sm:$0xff] %vm516_vm1, %v509_v6  ;;  %v500_v39 = vmul.f32 %v1459_v21, %v489_v33 }
 0x2bc   : > { %v1014_v40 = vpop.eup %1013  ;;  %v510_v22 = vadd.f32 %v1457_v13, %v499_v36  ;;  %v490_v41 = vmul.f32 %v1012_v38, %v1294_v27 }
 0x2bd   : > { %v511_v11 = vadd.f32 %v1457_v13, %v500_v39  ;;  %v491_v44 = vmul.f32 %v1014_v40, %v1277_v19 }
 0x2be   : > { %519 = vst.msk [vmem:[%s1320_s28 + $0x10] sm:$0xff] %vm516_vm1, %v510_v22  ;;  %v501_v63 = vmul.f32 %v1459_v21, %v490_v41 }
 0x2bf   : > { %v1016_v48 = vpop.eup %1015  ;;  %520 = vst.msk [vmem:[%s1320_s28 + $0x18] sm:$0xff] %vm516_vm1, %v511_v11  ;;  %v502_v49 = vmul.f32 %v1459_v21, %v491_v44 }
 0x2c0   : > { %v1018_v50 = vpop.eup %1017  ;;  %v512_v51 = vadd.f32 %v1457_v13, %v501_v63  ;;  %v492_v27 = vmul.f32 %v1016_v48, %v1303_v31  ;;  %v634_v31 = vpop.xlane.xlu1 %633 }
 0x2c1   : > { %v513_v52 = vadd.f32 %v1457_v13, %v502_v49  ;;  %v493_v19 = vmul.f32 %v1018_v50, %v1289_v25  ;;  %v631_v25 = vpop.xlane.xlu0 %630  ;;  %v654_v18 = vmul.f32 0.03125, %v634_v31 }
 0x2c2   : > { %521 = vst.msk [vmem:[%s1320_s28 + $0x20] sm:$0xff] %vm516_vm1, %v512_v51  ;;  %v503_v1 = vmul.f32 %v1459_v21, %v492_v27 }
 0x2c3   : > { %522 = vst.msk [vmem:[%s1320_s28 + $0x28] sm:$0xff] %vm516_vm1, %v513_v52  ;;  %v504_v5 = vmul.f32 %v1459_v21, %v493_v19  ;;  %v653_v21 = vmul.f32 0.03125, %v631_v25  ;;  %v662_v26 = vadd.f32 1e-06, %v654_v18 }
 0x2c4   : > { %v514_v16 = vadd.f32 %v1457_v13, %v503_v1  ;;  %v646_v58 = vpop.xlane.xlu1 %645 }
 0x2c5   : > { %v515_v56 = vadd.f32 %v1457_v13, %v504_v5  ;;  %v637_v61 = vpop.xlane.xlu0 %636  ;;  %v658_v12 = vmul.f32 0.03125, %v646_v58  ;;  %v661_v13 = vadd.f32 1e-06, %v653_v21 }
 0x2c6   : > { %523 = vst.msk [vmem:[%s1320_s28 + $0x30] sm:$0xff] %vm516_vm1, %v514_v16  ;;  %v655_v20 = vmul.f32 0.03125, %v637_v61 }
 0x2c7   : > { %524 = vst.msk [vmem:[%s1320_s28 + $0x38] sm:$0xff] %vm516_vm1, %v515_v56  ;;  %v666_v32 = vadd.f32 1e-06, %v658_v12  ;;  %1019 = vrsqrt.f32 %v661_v13 }
 0x2c8   : > { %v652_v53 = vpop.xlane.xlu1 %651  ;;  %v663_v43 = vadd.f32 1e-06, %v655_v20  ;;  %1021 = vrsqrt.f32 %v662_v26 }
 0x2c9   : > { %v640_v7 = vpop.xlane.xlu0 %639  ;;  %v660_v4 = vmul.f32 0.03125, %v652_v53 }
 0x2ca   : > { %v656_v23 = vmul.f32 0.03125, %v640_v7  ;;  %1023 = vrsqrt.f32 %v663_v43 }
 0x2cb   : > { %v668_v36 = vadd.f32 1e-06, %v660_v4  ;;  %1025 = vrsqrt.f32 %v666_v32 }
 0x2cc   : > { %v664_v6 = vadd.f32 1e-06, %v656_v23 }
 0x2cd   : > { %v643_v14 = vpop.xlane.xlu0 %642 }
 0x2ce   : > { %v657_v30 = vmul.f32 0.03125, %v643_v14  ;;  %1027 = vrsqrt.f32 %v664_v6 }
 0x2cf   : > { %1029 = vrsqrt.f32 %v668_v36 }
 0x2d0   : > { %v665_v40 = vadd.f32 1e-06, %v657_v30 }
 0x2d1   : > { %v649_v24 = vpop.xlane.xlu0 %648  ;;  %v1020_v5 = vpop.eup %1019 }
 0x2d2   : > { %v659_v17 = vmul.f32 0.03125, %v649_v24  ;;  %1031 = vrsqrt.f32 %v665_v40  ;;  %v1022_v56 = vpop.eup %1021 }
 0x2d3   : > { %v678_v14 = vmul.f32 %v1022_v56, %v1331_v37 }
 0x2d4   : > { %v667_v41 = vadd.f32 1e-06, %v659_v17  ;;  %v1024_v31 = vpop.eup %1023 }
 0x2d5   : > { %v1026_v58 = vpop.eup %1025  ;;  %v679_v18 = vmul.f32 %v1024_v31, %v1342_v46 }
 0x2d6   : > { %1033 = vrsqrt.f32 %v667_v41  ;;  %v682_v20 = vmul.f32 %v1026_v58, %v1385_v28 }
 0x2d7   : > { %v690_v28 = vmul.f32 %v1486_v34, %v679_v18 }
 0x2d8   : > { %v1028_v53 = vpop.eup %1027 }
 0x2d9   : > { %v1030_v25 = vpop.eup %1029  ;;  %v680_v12 = vmul.f32 %v1028_v53, %v1363_v62  ;;  %v693_v62 = vmul.f32 %v1486_v34, %v682_v20 }
 0x2da   : > { %v684_v23 = vmul.f32 %v1030_v25, %v1400_v35 }
 0x2db   : > { %v691_v30 = vmul.f32 %v1486_v34, %v680_v12 }
 0x2e9   : > { %v822_v60 = vpop.xlane.xlu1 %821 }
 0x2ea   : > { %v844_v33 = vmul.f32 0.03125, %v822_v60  ;;  %v1032_v60 = vpop.eup %1031 }
 0x2eb   : > { %v1034_v61 = vpop.eup %1033  ;;  %v681_v24 = vmul.f32 %v1032_v60, %v1355_v59  ;;  %v695_v59 = vmul.f32 %v1486_v34, %v684_v23 }
 0x2ec   : > { %v852_v63 = vadd.f32 1e-06, %v844_v33  ;;  %v683_v26 = vmul.f32 %v1034_v61, %v1377_v3 }
 0x2ed   : > { %v825_v57 = vpop.xlane.xlu1 %824  ;;  %v692_v3 = vmul.f32 %v1486_v34, %v681_v24 }
 0x2ee   : > { %v845_v38 = vmul.f32 0.03125, %v825_v57  ;;  %1035 = vrsqrt.f32 %v852_v63  ;;  %v694_v32 = vmul.f32 %v1486_v34, %v683_v26 }
 0x2f0   : > { %v853_v49 = vadd.f32 1e-06, %v845_v38 }
 0x2f1   : > { %v828_v10 = vpop.xlane.xlu1 %827 }
 0x2f2   : > { %v846_v22 = vmul.f32 0.03125, %v828_v10  ;;  %1037 = vrsqrt.f32 %v853_v49  ;;  %v677_v10 = vmul.f32 %v1020_v5, %v1324_v29 }
 0x2f4   : > { %v854_v51 = vadd.f32 1e-06, %v846_v22  ;;  %v688_v37 = vmul.f32 %v1486_v34, %v677_v10 }
 0x2f5   : > { %v831_v15 = vpop.xlane.xlu1 %830  ;;  %v840_v39 = vpop.xlane.xlu0 %839 }
 0x2f6   : > { %v847_v11 = vmul.f32 0.03125, %v831_v15  ;;  %v850_v48 = vmul.f32 0.03125, %v840_v39  ;;  %1039 = vrsqrt.f32 %v854_v51 }
 0x2f8   : > { %v855_v52 = vadd.f32 1e-06, %v847_v11  ;;  %v858_v19 = vadd.f32 1e-06, %v850_v48  ;;  %v1036_v57 = vpop.eup %1035 }
 0x2f9   : > { %v834_v45 = vpop.xlane.xlu1 %833  ;;  %v868_v17 = vmul.f32 %v1036_v57, %v1408_v47 }
 0x2fa   : > { %v848_v50 = vmul.f32 0.03125, %v834_v45  ;;  %1041 = vrsqrt.f32 %v855_v52  ;;  %v689_v45 = vmul.f32 %v1486_v34, %v678_v14 }
 0x2fb   : > { %1043 = vrsqrt.f32 %v858_v19 }
 0x2fc   : > { %v856_v1 = vadd.f32 1e-06, %v848_v50  ;;  %v1038_v7 = vpop.eup %1037 }
 0x2fd   : > { %v837_v44 = vpop.xlane.xlu1 %836  ;;  %v869_v6 = vmul.f32 %v1038_v7, %v1411_v42 }
 0x2fe   : > { %v849_v27 = vmul.f32 0.03125, %v837_v44  ;;  %1045 = vrsqrt.f32 %v856_v1 }
 0x300   : > { %v857_v16 = vadd.f32 1e-06, %v849_v27  ;;  %v1040_v21 = vpop.eup %1039 }
 0x301   : > { %v1535_v15 = vpop.permute.xlu1 %876  ;;  %v870_v33 = vmul.f32 %v1040_v21, %v1418_v54 }
 0x302   : > { %1047 = vrsqrt.f32 %v857_v16  ;;  %v879_v34 = vmul.f32 %v1535_v15, %v868_v17 }
 0x303   : > { %v881_v63 = vmul.f32 %v1535_v15, %v870_v33 }
 0x304   : > { %v1042_v13 = vpop.eup %1041 }
 0x305   : > { %v1044_v4 = vpop.eup %1043  ;;  %v871_v36 = vmul.f32 %v1042_v13, %v1421_v55 }
 0x306   : > { %v874_v39 = vmul.f32 %v1044_v4, %v1442_v9 }
 0x307   : > { %v882_v48 = vmul.f32 %v1535_v15, %v871_v36 }
 0x308   : > { %v1046_v29 = vpop.eup %1045  ;;  %v885_v27 = vmul.f32 %v1535_v15, %v874_v39 }
 0x309   : > { %v872_v40 = vmul.f32 %v1046_v29, %v1430_v0 }
 0x30b   : > { %v883_v49 = vmul.f32 %v1535_v15, %v872_v40 }
 0x30c   : > { %v1048_v46 = vpop.eup %1047 }
 0x30d   : > { %v873_v22 = vmul.f32 %v1048_v46, %v1433_v2  ;;  %v880_v2 = vmul.f32 %v1535_v15, %v869_v6 }
 0x30f   : > { %v884_v50 = vmul.f32 %v1535_v15, %v873_v22 }
 0x332   : > { %v843_v43 = vpop.xlane.xlu1 %842 }
 0x333   : > { %v851_v35 = vmul.f32 0.03125, %v843_v43 }
 0x335   : > { %v859_v38 = vadd.f32 1e-06, %v851_v35 }
 0x336   : > { %v697_v41 = vpop.permute.xlu1 %696 }
 0x337   : > { %1049 = vrsqrt.f32 %v859_v38  ;;  %v699_v47 = vadd.f32 %v697_v41, %v688_v37  ;;  %v700_v42 = vadd.f32 %v697_v41, %v689_v45  ;;  %v701_v11 = vadd.f32 %v697_v41, %v690_v28 }
 0x338   : > { %v702_v54 = vadd.f32 %v697_v41, %v691_v30  ;;  %v703_v55 = vadd.f32 %v697_v41, %v692_v3  ;;  %v704_v9 = vadd.f32 %v697_v41, %v693_v62  ;;  %v705_v0 = vadd.f32 %v697_v41, %v694_v32 }
 0x339   : > { %v706_v44 = vadd.f32 %v697_v41, %v695_v59  ;;  %708 = vst.msk [vmem:[%s1320_s28] sm:$0xff] %vm707_vm2, %v699_v47  ;;  %709 = vst.msk [vmem:[%s1320_s28 + $0x8] sm:$0xff] %vm707_vm2, %v700_v42 }
 0x33a   : > { %710 = vst.msk [vmem:[%s1320_s28 + $0x10] sm:$0xff] %vm707_vm2, %v701_v11  ;;  %v888_v51 = vpop.permute.xlu1 %887  ;;  %711 = vst.msk [vmem:[%s1320_s28 + $0x18] sm:$0xff] %vm707_vm2, %v702_v54 }
 0x33b   : > { %712 = vst.msk [vmem:[%s1320_s28 + $0x20] sm:$0xff] %vm707_vm2, %v703_v55  ;;  %713 = vst.msk [vmem:[%s1320_s28 + $0x28] sm:$0xff] %vm707_vm2, %v704_v9  ;;  %v890_v52 = vadd.f32 %v888_v51, %v879_v34  ;;  %v891_v19 = vadd.f32 %v888_v51, %v880_v2  ;;  %v892_v1 = vadd.f32 %v888_v51, %v881_v63 }
 0x33c   : > { %714 = vst.msk [vmem:[%s1320_s28 + $0x30] sm:$0xff] %vm707_vm2, %v705_v0  ;;  %715 = vst.msk [vmem:[%s1320_s28 + $0x38] sm:$0xff] %vm707_vm2, %v706_v44  ;;  %v893_v5 = vadd.f32 %v888_v51, %v882_v48  ;;  %v894_v16 = vadd.f32 %v888_v51, %v883_v49  ;;  %v895_v56 = vadd.f32 %v888_v51, %v884_v50 }
 0x33d   : > { %v896_v31 = vadd.f32 %v888_v51, %v885_v27  ;;  %899 = vst.msk [vmem:[%s1320_s28] sm:$0xff] %vm898_vm3, %v890_v52  ;;  %900 = vst.msk [vmem:[%s1320_s28 + $0x8] sm:$0xff] %vm898_vm3, %v891_v19 }
 0x33e   : > { %901 = vst.msk [vmem:[%s1320_s28 + $0x10] sm:$0xff] %vm898_vm3, %v892_v1  ;;  %902 = vst.msk [vmem:[%s1320_s28 + $0x18] sm:$0xff] %vm898_vm3, %v893_v5 }
 0x33f   : > { %903 = vst.msk [vmem:[%s1320_s28 + $0x20] sm:$0xff] %vm898_vm3, %v894_v16  ;;  %904 = vst.msk [vmem:[%s1320_s28 + $0x28] sm:$0xff] %vm898_vm3, %v895_v56 }
 0x340   : > { %905 = vst.msk [vmem:[%s1320_s28 + $0x30] sm:$0xff] %vm898_vm3, %v896_v31 }
 0x341   : > { %v1050_v58 = vpop.eup %1049 }
 0x342   : > { %v875_v53 = vmul.f32 %v1050_v58, %v1445_v8 }
 0x344   : > { %v886_v25 = vmul.f32 %v1535_v15, %v875_v53 }
 0x346   : > { %v897_v60 = vadd.f32 %v888_v51, %v886_v25 }
 0x348   : > { %906 = vst.msk [vmem:[%s1320_s28 + $0x38] sm:$0xff] %vm898_vm3, %v897_v60 }
 0x349 PF: > { %s13_s12 = sadd.s32 1, %s1057_s12  }
 0x34a   : > { %p10_p4 = scmp.ge.s32.totalorder %s13_s12, 4  }
 0x34c   :  { %12 = sbr.rel (!%p10_p4) target bundleno = 1 (0x1), region = 62 }

</bundles_post_ra>
